<compile_context>
chip_gen: v5e
topology: v5e:2x2
jax: 0.10.0
libtpu: 0.0.40
codegen_flags: <defaults>
</compile_context>

<pallas_src>
import functools

import jax
import jax.numpy as jnp
from jax.experimental import pallas as pl
from jax.experimental.pallas import tpu as pltpu


def _round_up(x, m):
    return ((x + m - 1) // m) * m


def esm_head_kernel(tok_ref, mask_ref, inv_cnt_ref, w1_ref, b1_ref, w2_ref,
                    b2_ref, out_ref, sum_acc):
    """Masked mean-pool (accumulated over sequence tiles) + 2-layer head."""
    s = pl.program_id(1)

    # ---- init accumulator at the first sequence tile of each batch tile ----
    @pl.when(s == 0)
    def _init():
        sum_acc[...] = jnp.zeros_like(sum_acc)

    # ---- masked partial sum on the MXU (bf16 x bf16 -> f32 accumulation) ----
    # mask tile: (TB, 1, TS)  token tile: (TB, TS, H)  ->  (TB, 1, H)
    psum = jnp.einsum("bqs,bsh->bqh", mask_ref[...], tok_ref[...],
                      preferred_element_type=jnp.float32)
    sum_acc[...] += jnp.sum(psum, axis=1)                       # (TB, H) f32

    # ---- finalize: mean -> Linear -> ReLU -> (eval dropout) -> Linear ----
    @pl.when(s == pl.num_programs(1) - 1)
    def _finalize():
        # inv_cnt = 1 / clamp(num_tokens, 1e-9), precomputed in the wrapper.
        mean = (sum_acc[...] * inv_cnt_ref[...]).astype(w1_ref.dtype)  # (TB,H)

        h = jnp.dot(mean, w1_ref[...],
                    preferred_element_type=jnp.float32) + b1_ref[...]
        h = jnp.maximum(h, 0.0).astype(w2_ref.dtype)
        # nn.Dropout is identity at inference time.
        # TODO(synk): training-mode dropout (random mask) not implemented.
        logits = jnp.dot(h, w2_ref[...],
                         preferred_element_type=jnp.float32) + b2_ref[...]
        out_ref[...] = logits.astype(out_ref.dtype)


@functools.partial(jax.jit, static_argnames=("batch_tile", "seq_tile"))
def finetuned_esm_head(token_embeddings, attention_mask, w1, b1, w2, b2,
                       *, batch_tile=16, seq_tile=512):
    """FinetunedESM head on top of precomputed token embeddings.

    token_embeddings: (B, S, H)   attention_mask: (B, S) of 0/1
    w1: (H, H), b1: (1, H), w2: (H, C), b2: (1, C)   (y = x @ W + b layout)
    """
    B, S, H = token_embeddings.shape
    C = w2.shape[1]

    # --- streamed data stays bf16 in HBM; f32 accumulation inside kernel ---
    tok = token_embeddings.astype(jnp.bfloat16)
    mask = attention_mask.astype(jnp.float32)
    w1b = w1.astype(jnp.bfloat16)
    w2b = w2.astype(jnp.bfloat16)
    b1f = b1.astype(jnp.float32).reshape(1, H)
    b2f = b2.astype(jnp.float32).reshape(1, C)

    # --- pad classifier dim to a lane-dense multiple of 128 ---
    Cp = _round_up(C, 128)
    if Cp != C:
        w2b = jnp.pad(w2b, ((0, 0), (0, Cp - C)))
        b2f = jnp.pad(b2f, ((0, 0), (0, Cp - C)))

    # --- batch tile: sublane aligned; prefer >= 2 batch tiles so the
    #     "parallel" batch axis can split across the two v7x TensorCores ---
    TB = _round_up(min(batch_tile, _round_up(B, 8)), 8)
    if _round_up(B, TB) == TB and TB > 8:
        TB = max(8, _round_up(TB // 2, 8))
    Bp = _round_up(B, TB)

    # --- generation-aware VMEM budget (v7x: 64 MiB, v5e/v6e: 128 MiB) ---
    try:
        vmem_cap = int(pltpu.get_tpu_info().vmem_capacity_bytes)
    except Exception:
        vmem_cap = 64 * 1024 * 1024
    vmem_limit = min(vmem_cap - 8 * 1024 * 1024, 112 * 1024 * 1024)
    vmem_limit = max(vmem_limit, 32 * 1024 * 1024)

    # --- sequence tile: largest tile that keeps
    #     2 x (TB*TS*H bf16) token buffers + single-copy weights under budget ---
    Sp_min = _round_up(S, 16)                              # bf16 sublane packing
    ts_req = Sp_min if _round_up(seq_tile, 128) >= Sp_min else _round_up(seq_tile, 128)
    resident = (H * H + H * Cp) * 2 + (H + Cp) * 4         # w1,w2 bf16 + b1,b2 f32
    misc = TB * H * 4 + 4 * TB * Cp * 4 + (2 << 20)        # sum_acc, out bufs, slack
    tok_budget = max(vmem_limit - resident - misc, 2 * TB * 128 * H * 2)
    ts_fit = max(128, (tok_budget // (2 * TB * H * 2)) // 128 * 128)
    TS = ts_req if ts_req <= ts_fit else ts_fit
    Sp = _round_up(S, TS)

    # --- pad batch / sequence (zero mask) so the tiles divide evenly ---
    if (Bp, Sp) != (B, S):
        tok = jnp.pad(tok, ((0, Bp - B), (0, Sp - S), (0, 0)))
        mask = jnp.pad(mask, ((0, Bp - B), (0, Sp - S)))

    # mask laid out (Bp, 1, Sp): sequence on lanes -> lane-dense DMA + MXU lhs.
    mask3 = mask.astype(jnp.bfloat16).reshape(Bp, 1, Sp)
    # per-row token counts precomputed in the wrapper (removes in-kernel reduce)
    cnt = jnp.sum(mask, axis=1, keepdims=True)             # (Bp, 1) f32, exact 0/1
    inv_cnt = 1.0 / jnp.maximum(cnt, 1e-9)

    grid = (pl.cdiv(Bp, TB), pl.cdiv(Sp, TS))

    out = pl.pallas_call(
        esm_head_kernel,
        out_shape=jax.ShapeDtypeStruct((Bp, Cp), jnp.float32),
        grid=grid,
        in_specs=[
            # streamed, double-buffered token tiles
            pl.BlockSpec((TB, TS, H), lambda b, s: (b, s, 0)),
            # mask (Bp, 1, Sp): sequence tile on lanes
            pl.BlockSpec((TB, 1, TS), lambda b, s: (b, 0, s)),
            # per-row 1/num_tokens
            pl.BlockSpec((TB, 1), lambda b, s: (b, 0)),
            # weights / biases: whole-array VMEM residents (single copy,
            # no double buffering) -> frees ~13 MB for real ESM2 shapes
            pl.BlockSpec(memory_space=pltpu.MemorySpace.VMEM),
            pl.BlockSpec(memory_space=pltpu.MemorySpace.VMEM),
            pl.BlockSpec(memory_space=pltpu.MemorySpace.VMEM),
            pl.BlockSpec(memory_space=pltpu.MemorySpace.VMEM),
        ],
        out_specs=pl.BlockSpec((TB, Cp), lambda b, s: (b, 0)),
        scratch_shapes=[
            pltpu.VMEM((TB, H), jnp.float32),   # masked-sum accumulator
        ],
        compiler_params=pltpu.CompilerParams(
            dimension_semantics=("parallel", "arbitrary"),
            vmem_limit_bytes=vmem_limit,
        ),
    )(tok, mask3, inv_cnt, w1b, b1f, w2b, b2f)

    return out[:B, :C]


def reference_head(token_embeddings, attention_mask, w1, b1, w2, b2):
    """Pure-JAX reference mirroring the kernel's dtype flow (bf16 in, f32 acc)."""
    tok = token_embeddings.astype(jnp.bfloat16).astype(jnp.float32)
    m = attention_mask.astype(jnp.bfloat16).astype(jnp.float32)[:, :, None]
    sum_emb = jnp.sum(tok * m, axis=1)
    cnt = jnp.maximum(jnp.sum(m, axis=1), 1e-9)
    mean = (sum_emb / cnt).astype(jnp.bfloat16)
    h = jnp.dot(mean, w1.astype(jnp.bfloat16),
                preferred_element_type=jnp.float32) + b1.astype(jnp.float32)
    h = jnp.maximum(h, 0.0).astype(jnp.bfloat16)
    logits = jnp.dot(h, w2.astype(jnp.bfloat16),
                     preferred_element_type=jnp.float32) + b2.astype(jnp.float32)
    return logits


if __name__ == "__main__":
    # Small shapes consistent with the module's forward pass (hidden scaled down).
    B, S, H, C = 12, 32, 128, 100   # batch, seq len, embedding_dim, num_classes

    key = jax.random.PRNGKey(0)
    k_tok, k_w1, k_b1, k_w2, k_b2 = jax.random.split(key, 5)

    # Synthetic "last_hidden_state" from the (not re-implemented) ESM backbone.
    token_embeddings = jax.random.normal(k_tok, (B, S, H), dtype=jnp.float32)

    # Attention mask: prefix of 1s per sequence (padded protein sequences).
    lengths = jnp.array([S, S - 3, S - 7, 5, S, 17, 9, S - 1, 26, 11, 3, S - 12],
                        dtype=jnp.int32)
    attention_mask = (jnp.arange(S)[None, :] < lengths[:, None]).astype(jnp.float32)

    # Head parameters (torch Linear y = x @ W^T + b; we store W^T directly).
    w1 = jax.random.normal(k_w1, (H, H), dtype=jnp.float32) * (1.0 / jnp.sqrt(H))
    b1 = jax.random.normal(k_b1, (1, H), dtype=jnp.float32) * 0.01
    w2 = jax.random.normal(k_w2, (H, C), dtype=jnp.float32) * (1.0 / jnp.sqrt(H))
    b2 = jax.random.normal(k_b2, (1, C), dtype=jnp.float32) * 0.01

    logits = finetuned_esm_head(token_embeddings, attention_mask, w1, b1, w2, b2)
    logits = jax.block_until_ready(logits)

    ref = reference_head(token_embeddings, attention_mask, w1, b1, w2, b2)
    assert logits.shape == (B, C), logits.shape
    assert jnp.allclose(logits, ref, atol=1e-2, rtol=1e-2), "mismatch vs reference"

    print("KERNEL_OK")
</pallas_src>

<mosaic_0001>
module attributes {stable_mosaic.version = 11 : i64} {
  func.func @esm_head_kernel(%arg0: i32, %arg1: i32, %arg2: memref<8x32x128xbf16, #tpu.memory_space<vmem>>, %arg3: memref<8x1x32xbf16, #tpu.memory_space<vmem>>, %arg4: memref<8x1xf32, #tpu.memory_space<vmem>>, %arg5: memref<128x128xbf16, #tpu.memory_space<vmem>>, %arg6: memref<1x128xf32, #tpu.memory_space<vmem>>, %arg7: memref<128x128xbf16, #tpu.memory_space<vmem>>, %arg8: memref<1x128xf32, #tpu.memory_space<vmem>>, %arg9: memref<8x128xf32, #tpu.memory_space<vmem>>, %arg10: memref<8x128xf32, #tpu.memory_space<vmem>>) attributes {dimension_semantics = [#tpu.dimension_semantics<parallel>, #tpu.dimension_semantics<arbitrary>], iteration_bounds = array<i64: 2, 1>, scalar_prefetch = 0 : i64, scratch_operands = 1 : i64, tpu.core_type = #tpu.core_type<tc>, window_params = [{transform_indices = @transform_0, window_bounds = array<i64: 8, 32, 128>}, {transform_indices = @transform_1, window_bounds = array<i64: 8, 1, 32>}, {transform_indices = @transform_2, window_bounds = array<i64: 8, 1>}, {pipeline_mode = #tpu.pipeline_mode<synchronous>, transform_indices = @transform_3, window_bounds = array<i64: 128, 128>}, {pipeline_mode = #tpu.pipeline_mode<synchronous>, transform_indices = @transform_4, window_bounds = array<i64: 1, 128>}, {pipeline_mode = #tpu.pipeline_mode<synchronous>, transform_indices = @transform_5, window_bounds = array<i64: 128, 128>}, {pipeline_mode = #tpu.pipeline_mode<synchronous>, transform_indices = @transform_6, window_bounds = array<i64: 1, 128>}, {transform_indices = @transform_7, window_bounds = array<i64: 8, 128>}]} {
    %c0_i32 = arith.constant 0 : i32
    %0 = arith.cmpi eq, %arg1, %c0_i32 : i32
    %1 = arith.extui %0 : i1 to i32
    %c0_i32_0 = arith.constant 0 : i32
    %2 = arith.cmpi ne, %1, %c0_i32_0 : i32
    scf.if %2 {
      %cst_13 = arith.constant 0.000000e+00 : f32
      %13 = vector.broadcast %cst_13 : f32 to vector<8x128xf32>
      %c0_14 = arith.constant 0 : index
      %c0_15 = arith.constant 0 : index
      %14 = vector.load %arg10[%c0_14, %c0_15] : memref<8x128xf32, #tpu.memory_space<vmem>>, vector<8x128xf32>
      tpu.vector_store %arg10[%c0_14, %c0_15], %13 {strides = array<i32>} : memref<8x128xf32, #tpu.memory_space<vmem>>, vector<8x128xf32>,
    } else {
    }
    %c0 = arith.constant 0 : index
    %c0_1 = arith.constant 0 : index
    %c0_2 = arith.constant 0 : index
    %3 = vector.load %arg3[%c0, %c0_1, %c0_2] : memref<8x1x32xbf16, #tpu.memory_space<vmem>>, vector<8x1x32xbf16>
    %c0_3 = arith.constant 0 : index
    %c0_4 = arith.constant 0 : index
    %c0_5 = arith.constant 0 : index
    %4 = vector.load %arg2[%c0_3, %c0_4, %c0_5] : memref<8x32x128xbf16, #tpu.memory_space<vmem>>, vector<8x32x128xbf16>
    "tpu.trace_start"() <{level = 10 : i32, message = "bqs,bsh->bqh"}> : () -> ()
    %cst = arith.constant dense<0.000000e+00> : vector<8x1x128xf32>
    %5 = tpu.matmul %3, %4, %cst {dimension_numbers = #tpu.dot_dimension_numbers<[2], [1], [1], [2], [0, 0, 0, 1, 1, 2], [0], [0]>} : vector<8x1x32xbf16>, vector<8x32x128xbf16>, vector<8x1x128xf32> -> vector<8x1x128xf32>
    "tpu.trace_stop"() : () -> ()
    %c0_6 = arith.constant 0 : index
    %c0_7 = arith.constant 0 : index
    %6 = vector.load %arg10[%c0_6, %c0_7] : memref<8x128xf32, #tpu.memory_space<vmem>>, vector<8x128xf32>
    %cst_8 = arith.constant dense<0.000000e+00> : vector<8x128xf32>
    %7 = vector.multi_reduction <add>, %5, %cst_8 [1] : vector<8x1x128xf32> to vector<8x128xf32>
    %8 = arith.addf %6, %7 : vector<8x128xf32>
    %c0_9 = arith.constant 0 : index
    %c0_10 = arith.constant 0 : index
    %9 = vector.load %arg10[%c0_9, %c0_10] : memref<8x128xf32, #tpu.memory_space<vmem>>, vector<8x128xf32>
    tpu.vector_store %arg10[%c0_9, %c0_10], %8 {strides = array<i32>} : memref<8x128xf32, #tpu.memory_space<vmem>>, vector<8x128xf32>,
    %c0_i32_11 = arith.constant 0 : i32
    %10 = arith.cmpi eq, %arg1, %c0_i32_11 : i32
    %11 = arith.extui %10 : i1 to i32
    %c0_i32_12 = arith.constant 0 : i32
    %12 = arith.cmpi ne, %11, %c0_i32_12 : i32
    scf.if %12 {
      %c0_13 = arith.constant 0 : index
      %c0_14 = arith.constant 0 : index
      %13 = vector.load %arg10[%c0_13, %c0_14] : memref<8x128xf32, #tpu.memory_space<vmem>>, vector<8x128xf32>
      %c0_15 = arith.constant 0 : index
      %c0_16 = arith.constant 0 : index
      %14 = vector.load %arg4[%c0_15, %c0_16] : memref<8x1xf32, #tpu.memory_space<vmem>>, vector<8x1xf32>
      %15 = vector.broadcast %14 : vector<8x1xf32> to vector<8x128xf32>
      %16 = arith.mulf %13, %15 : vector<8x128xf32>
      %17 = arith.truncf %16 : vector<8x128xf32> to vector<8x128xbf16>
      %c0_17 = arith.constant 0 : index
      %c0_18 = arith.constant 0 : index
      %18 = vector.load %arg5[%c0_17, %c0_18] : memref<128x128xbf16, #tpu.memory_space<vmem>>, vector<128x128xbf16>
      %cst_19 = arith.constant dense<0.000000e+00> : vector<8x128xf32>
      %19 = tpu.matmul %17, %18, %cst_19 {dimension_numbers = #tpu.dot_dimension_numbers<[1], [0], [0], [1], [0, 0, 1, 1], [], []>} : vector<8x128xbf16>, vector<128x128xbf16>, vector<8x128xf32> -> vector<8x128xf32>
      %c0_20 = arith.constant 0 : index
      %c0_21 = arith.constant 0 : index
      %20 = vector.load %arg6[%c0_20, %c0_21] : memref<1x128xf32, #tpu.memory_space<vmem>>, vector<1x128xf32>
      %21 = vector.broadcast %20 : vector<1x128xf32> to vector<8x128xf32>
      %22 = arith.addf %19, %21 : vector<8x128xf32>
      %cst_22 = arith.constant 0.000000e+00 : f32
      %23 = vector.broadcast %cst_22 : f32 to vector<8x128xf32>
      %24 = arith.maximumf %22, %23 : vector<8x128xf32>
      %25 = arith.truncf %24 : vector<8x128xf32> to vector<8x128xbf16>
      %c0_23 = arith.constant 0 : index
      %c0_24 = arith.constant 0 : index
      %26 = vector.load %arg7[%c0_23, %c0_24] : memref<128x128xbf16, #tpu.memory_space<vmem>>, vector<128x128xbf16>
      %cst_25 = arith.constant dense<0.000000e+00> : vector<8x128xf32>
      %27 = tpu.matmul %25, %26, %cst_25 {dimension_numbers = #tpu.dot_dimension_numbers<[1], [0], [0], [1], [0, 0, 1, 1], [], []>} : vector<8x128xbf16>, vector<128x128xbf16>, vector<8x128xf32> -> vector<8x128xf32>
      %c0_26 = arith.constant 0 : index
      %c0_27 = arith.constant 0 : index
      %28 = vector.load %arg8[%c0_26, %c0_27] : memref<1x128xf32, #tpu.memory_space<vmem>>, vector<1x128xf32>
      %29 = vector.broadcast %28 : vector<1x128xf32> to vector<8x128xf32>
      %30 = arith.addf %27, %29 : vector<8x128xf32>
      %c0_28 = arith.constant 0 : index
      %c0_29 = arith.constant 0 : index
      %31 = vector.load %arg9[%c0_28, %c0_29] : memref<8x128xf32, #tpu.memory_space<vmem>>, vector<8x128xf32>
      tpu.vector_store %arg9[%c0_28, %c0_29], %30 {strides = array<i32>} : memref<8x128xf32, #tpu.memory_space<vmem>>, vector<8x128xf32>,
    } else {
    }
    return
  }
  func.func @transform_0(%arg0: i32, %arg1: i32) -> (i32, i32, i32) {
    %c0_i32 = arith.constant 0 : i32
    %c0_i32_0 = arith.constant 0 : i32
    return %arg0, %arg1, %c0_i32 : i32, i32, i32
  }
  func.func @transform_1(%arg0: i32, %arg1: i32) -> (i32, i32, i32) {
    %c0_i32 = arith.constant 0 : i32
    %c0_i32_0 = arith.constant 0 : i32
    return %arg0, %c0_i32, %arg1 : i32, i32, i32
  }
  func.func @transform_2(%arg0: i32, %arg1: i32) -> (i32, i32) {
    %c0_i32 = arith.constant 0 : i32
    %c0_i32_0 = arith.constant 0 : i32
    return %arg0, %c0_i32 : i32, i32
  }
  func.func @transform_3(%arg0: i32, %arg1: i32) -> (i32, i32) {
    %c0_i32 = arith.constant 0 : i32
    %c0_i32_0 = arith.constant 0 : i32
    %c0_i32_1 = arith.constant 0 : i32
    return %c0_i32, %c0_i32_0 : i32, i32
  }
  func.func @transform_4(%arg0: i32, %arg1: i32) -> (i32, i32) {
    %c0_i32 = arith.constant 0 : i32
    %c0_i32_0 = arith.constant 0 : i32
    %c0_i32_1 = arith.constant 0 : i32
    return %c0_i32, %c0_i32_0 : i32, i32
  }
  func.func @transform_5(%arg0: i32, %arg1: i32) -> (i32, i32) {
    %c0_i32 = arith.constant 0 : i32
    %c0_i32_0 = arith.constant 0 : i32
    %c0_i32_1 = arith.constant 0 : i32
    return %c0_i32, %c0_i32_0 : i32, i32
  }
  func.func @transform_6(%arg0: i32, %arg1: i32) -> (i32, i32) {
    %c0_i32 = arith.constant 0 : i32
    %c0_i32_0 = arith.constant 0 : i32
    %c0_i32_1 = arith.constant 0 : i32
    return %c0_i32, %c0_i32_0 : i32, i32
  }
  func.func @transform_7(%arg0: i32, %arg1: i32) -> (i32, i32) {
    %c0_i32 = arith.constant 0 : i32
    %c0_i32_0 = arith.constant 0 : i32
    return %arg0, %c0_i32 : i32, i32
  }
}

</mosaic_0001>

<bundles_post_ra>
// kernel: finetuned_esm_head.1
= control target key start
LH: loop header
LB: loop body
LE: loop exit
PB: predicated region body
PF: predicated region fallthrough
CT: control target
= control target key end

     0   :  { %12 = vsyncpa [#allocation4], 0  ;;  %s1521_s0 = inlined_call_operand.vmem [shape: bf16[16,32,128], index: 0, kind: input, shape index: {}]   ;;  %s1522_s1 = inlined_call_operand.vmem [shape: bf16[16,1,32], index: 1, kind: input, shape index: {}]   ;;  %s1523_s2 = inlined_call_operand.vmem [shape: f32[16,1], index: 2, kind: input, shape index: {}]   ;;  %s1524_s3 = inlined_call_operand.vmem [shape: bf16[128,128], index: 3, kind: input, shape index: {}]   ;;  %s1525_s4 = inlined_call_operand.vmem [shape: f32[1,128], index: 4, kind: input, shape index: {}]   ;;  %s1526_s5 = inlined_call_operand.vmem [shape: bf16[128,128], index: 5, kind: input, shape index: {}]   ;;  %s1527_s6 = inlined_call_operand.vmem [shape: f32[1,128], index: 6, kind: input, shape index: {}]   ;;  %s1528_s7 = inlined_call_operand.hbm [shape: f32[16,128], index: 7, kind: output, shape index: {}]  }
   0x1   :  { %14 = vsyncpa [#allocation4 + $0x1], 0  ;;  %s1323_s24 = smov 0   ;;  %s1325_s25 = smov 0  }
   0x2   :  { %s1327_s26 = smov 0   ;;  %s1329_s27 = smov 0  }
   0x3   :  { %s1331_s28 = smov 0   ;;  %s1333_s29 = smov 0  }
   0x4 LB: > { %s959_s30 = sadd.s32 4294967295, %s1280_s29   ;;  %s960_s8 = sadd.s32 4294967294, %s1280_s29   ;;  %s1280_s29 = sphi %s1333_s29, %s20_s29   ;;  %s1276_s28 = sphi %s1331_s28, %s1535_s28   ;;  %s1272_s27 = sphi %s1329_s27, %s1534_s27   ;;  %s1268_s26 = sphi %s1327_s26, %s1533_s26   ;;  %s1264_s25 = sphi %s1325_s25, %s1532_s25   ;;  %s1260_s24 = sphi %s1323_s24, %s1531_s24  }
   0x5   : > { %s32_s9 = sadd.s32 1, %s1276_s28  ;;  %s205_s10 = sadd.s32 1, %s1268_s26 }
   0x6   : > { %p34_p0 = scmp.ge.s32.totalorder %s32_s9, 2  ;;  %p215_p1 = scmp.ne.s32.totalorder %s1268_s26, %s1264_s25 }
   0x7   : > { %p216_p2 = scmp.eq.s32.totalorder %s959_s30, 1  ;;  %p221_p3 = scmp.ne.s32.totalorder %s1264_s25, %s1260_s24 }
   0x8   : > { %s1537_s9 = smov (%p34_p0, %s32_s9), 0  ;;  %p222_p5 = scmp.eq.s32.totalorder %s960_s8, 1 }
   0x9   : > { %p1363_p4 = por %p216_p2, %p215_p1  ;;  %s202_s12 = ssub.s32 %s1276_s28, %s1537_s9 }
   0xa   : > { %p963_p6 = scmp.ge.s32.totalorder %s1280_s29, 1  ;;  %p203_p7 = scmp.eq.s32.totalorder %s202_s12, 0 }
   0xb   : > { %p1370_p8 = por %p222_p5, %p221_p3  ;;  %p285_p9 = scmp.lt.s32.totalorder %s1280_s29, 3 }
   0xc   : > { %s1376_s14 = scalar_select %p203_p7, %s1268_s26, %s205_s10  }
   0xd   : > { %p286_p10 = pnand %p963_p6, %p285_p9 }
   0xe   : > { %s1379_s15 = sshll.u32 (!%p286_p10), %s1272_s27, 3  ;;  %p353_p12 = scmp.lt.s32.totalorder (!%p286_p10), %s1272_s27, 1 }
   0xf   : > { %289 = sbr.rel (%p286_p10) target bundleno = 470 (0x1d6), region = 48  ;;  %p335_p11 = scmp.lt.s32.totalorder (!%p286_p10), %s1379_s15, 15 }
  0x10   : > { %s1222_s10 = scalar_lea.hbm (!%p286_p10), %s1528_s7, 16 }
  0x14   : > { %s336_s16 = scalar_select %p335_p11, %s1379_s15, 15  ;;  %vm415_vm0 = vcmask 261120   ;;  %v1282_v17 = vmov 0   ;;  %v1134_v26 = vld [vmem:[%s1524_s3 + $0x38] sm:$0xff]  ;;  %v1133_v27 = vld [vmem:[%s1524_s3 + $0x30] sm:$0xff]  ;;  %v1132_v28 = vld [vmem:[%s1524_s3 + $0x28] sm:$0xff] }
  0x15   : > { %s1539_s27 = smov (!%p353_p12, %s1272_s27), 1  ;;  %1199 = vset.pattern.permute.xlu0 %v1282_v17  ;;  %v1131_v29 = vld [vmem:[%s1524_s3 + $0x20] sm:$0xff]  ;;  %v1130_v30 = vld [vmem:[%s1524_s3 + $0x18] sm:$0xff]  ;;  %v1129_v31 = vld [vmem:[%s1524_s3 + $0x10] sm:$0xff]  ;;  %vm646_vm1 = vcmask 1041409   ;;  %vm649_vm2 = vcmask 1042434  }
  0x16   : > { %s1110_s17 = sshll.u32 %s336_s16, 4  ;;  %s1397_s23 = scalar_lea.vmem %s1522_s1, %s336_s16  ;;  %v1128_v35 = vld [vmem:[%s1524_s3 + $0x8] sm:$0xff]  ;;  %v1127_v37 = vld [vmem:[%s1524_s3] sm:$0xff]  ;;  %v1142_v42 = vld [vmem:[%s1526_s5 + $0x38] sm:$0xff]  ;;  %vm652_vm3 = vcmask 1043459   ;;  %vm655_vm4 = vcmask 1044484  }
  0x17   : > { %s1387_s20 = scalar_lea.vmem %s1521_s0, %s1110_s17  ;;  %s969_s30 = sshll.u32 %s1539_s27, 3  ;;  %v363_v8 = vld [vmem:[%s1397_s23] sm:$0x1]  ;;  %v364_v9 = vld [vmem:[%s1397_s23 + $0x1] sm:$0x1]  ;;  %v1141_v43 = vld [vmem:[%s1526_s5 + $0x30] sm:$0xff] }
  0x18   : > { %v1112_v0 = vld [vmem:[%s1387_s20 + $0x8] sm:$0xff]  ;;  %v1114_v1 = vld [vmem:[%s1387_s20 + $0x18] sm:$0xff]  ;;  %v1111_v2 = vld [vmem:[%s1387_s20] sm:$0xff]  ;;  %s356_s27 = scalar_lea.vmem %s1523_s2, %s969_s30  ;;  %vm658_vm5 = vcmask 1045509   ;;  %vm661_vm6 = vcmask 1046534   ;;  %vm664_vm7 = vcmask 1047559  }
  0x19   : > { %425 = vmatpush.bf16.msra.mxu2 %v1112_v0  ;;  %453 = vmatpush.bf16.msra.mxu3 %v1114_v1  ;;  %v1113_v3 = vld [vmem:[%s1387_s20 + $0x10] sm:$0xff]  ;;  %v1116_v4 = vld [vmem:[%s1387_s20 + $0x28] sm:$0xff]  ;;  %v1118_v5 = vld [vmem:[%s1387_s20 + $0x38] sm:$0xff] }
  0x1a   : > { %v1120_v6 = vld [vmem:[%s1387_s20 + $0x48] sm:$0xff]  ;;  %v1122_v7 = vld [vmem:[%s1387_s20 + $0x58] sm:$0xff]  ;;  %v1119_v10 = vld [vmem:[%s1387_s20 + $0x40] sm:$0xff] }
  0x1b   : > { %537 = vmatpush.bf16.msra.mxu0 %v1120_v6  ;;  %v1115_v11 = vld [vmem:[%s1387_s20 + $0x20] sm:$0xff]  ;;  %v1117_v12 = vld [vmem:[%s1387_s20 + $0x30] sm:$0xff]  ;;  %v1124_v13 = vld [vmem:[%s1387_s20 + $0x68] sm:$0xff]  ;;  %565 = vmatpush.bf16.msra.mxu1 %v1122_v7 }
  0x1c   : > { %v1126_v14 = vld [vmem:[%s1387_s20 + $0x78] sm:$0xff]  ;;  %v1121_v15 = vld [vmem:[%s1387_s20 + $0x50] sm:$0xff]  ;;  %v367_v16 = vld [vmem:[%s1397_s23 + $0x4] sm:$0x1] }
  0x1d   : > { %426 = vmatpush.bf16.msra.mxu2 %v1111_v2  ;;  %454 = vmatpush.bf16.msra.mxu3 %v1113_v3  ;;  %v673_v18 = vld [vmem:[%s356_s27] sm:$0xff]  ;;  %v1125_v21 = vld [vmem:[%s1387_s20 + $0x70] sm:$0xff]  ;;  %v1140_v44 = vld [vmem:[%s1526_s5 + $0x28] sm:$0xff]  ;;  %s857_s27 = scalar_lea.hbm %s1528_s7, %s1379_s15 }
  0x1e   : > { %v1123_v19 = vld [vmem:[%s1387_s20 + $0x60] sm:$0xff]  ;;  %676 = vperm.xlu0 %1199, %v673_v18   ;;  %v1138_v50 = vld [vmem:[%s1526_s5 + $0x18] sm:$0xff]  ;;  %v1137_v57 = vld [vmem:[%s1526_s5 + $0x10] sm:$0xff]  ;;  %s861_s19 = sshll.u32 %s857_s27, 4  ;;  %s862_s19 = int_to_ptr.hbm [resolvable:$true] %s861_s19 }
  0x1f   : > { %538 = vmatpush.bf16.msra.mxu0 %v1119_v10  ;;  %566 = vmatpush.bf16.msra.mxu1 %v1121_v15  ;;  %v368_v20 = vld [vmem:[%s1397_s23 + $0x5] sm:$0x1]  ;;  %v365_v22 = vld [vmem:[%s1397_s23 + $0x2] sm:$0x1]  ;;  %v366_v23 = vld [vmem:[%s1397_s23 + $0x3] sm:$0x1] }
  0x20   : > { %978 = vmatmul.msk.bf16.vlgmr.msra.gmra.mxu2 %vm415_vm0, %v363_v8  ;;  %987 = vmatmul.msk.bf16.vlgmr.msra.gmra.mxu3 %vm415_vm0, %v364_v9  ;;  %v369_v24 = vld [vmem:[%s1397_s23 + $0x6] sm:$0x1]  ;;  %v370_v25 = vld [vmem:[%s1397_s23 + $0x7] sm:$0x1]  ;;  %v1136_v9 = vld [vmem:[%s1526_s5 + $0x8] sm:$0xff]  ;;  %s330_s23 = sand.u32 1, %s1264_s25  }
  0x21   : > { %481 = vmatpush.bf16.msrb.mxu2 %v1116_v4  ;;  %509 = vmatpush.bf16.msrb.mxu3 %v1118_v5  ;;  %v1139_v47 = vld [vmem:[%s1526_s5 + $0x20] sm:$0xff]  ;;  %s964_s30 = sshll.u32 %s330_s23, 3  ;;  %s847_s20 = scalar_lea.sflag [#allocation4], %s330_s23 }
  0x22   : > { %1014 = vmatmul.msk.bf16.vlgmr.msra.gmra.mxu0 %vm415_vm0, %v367_v16  ;;  %1023 = vmatmul.msk.bf16.vlgmr.msra.gmra.mxu1 %vm415_vm0, %v368_v20  ;;  %v1135_v10 = vld [vmem:[%s1526_s5] sm:$0xff]  ;;  %s332_s17 = scalar_lea.vmem [#allocation3], %s964_s30  ;;  %s1216_s21 = sshra.s32 %s862_s19, 4  ;;  %s1217_s21 = int_to_ptr.hbm [resolvable:$true] %s1216_s21 }
  0x23   : > { %749 = vmatpush.bf16.msrb.mxu0 %v1134_v26  ;;  %832 = vmatpush.bf16.msrb.mxu1 %v1142_v42  ;;  %v1201_v17 = vld [vmem:[%s1527_s6] ss:$0 sm:$0xff]  ;;  %s859_s18 = sshll.u32 %s332_s17, 4  ;;  %s1218_s22 = scalar_lea.hbm %s1217_s21, 8  ;;  %s860_s18 = int_to_ptr.vmem [resolvable:$true] %s859_s18 }
  0x24   : > { %p1219_p13 = scmp.ne.s32.totalorder %s1217_s21, %s1218_s22  ;;  %p1223_p2 = scmp.lt.s32.totalorder %s1217_s21, %s1528_s7 }
  0x25   : > { %482 = vmatpush.bf16.msrb.mxu2 %v1115_v11  ;;  %510 = vmatpush.bf16.msrb.mxu3 %v1117_v12  ;;  %v1200_v11 = vld [vmem:[%s1525_s4] ss:$0 sm:$0xff]  ;;  %p1224_p3 = scmp.lt.s32.totalorder %s1222_s10, %s1218_s22 }
  0x26   : > { %p1220_p0 = pnand %p1219_p13, %p1363_p4 }
  0x27   : > { %750 = vmatpush.bf16.msrb.mxu0 %v1133_v27  ;;  %833 = vmatpush.bf16.msrb.mxu1 %v1141_v43  ;;  %p1225_p5 = por %p1224_p3, %p1223_p2 }
  0x28   : > { %p1221_p1 = pneg %p1220_p0 }
  0x29   : > { %593 = vmatpush.bf16.msra.mxu2 %v1124_v13  ;;  %621 = vmatpush.bf16.msra.mxu3 %v1126_v14 }
  0x2a   : > { %p1226_p6 = pnand %p1225_p5, %p1221_p1 }
  0x2b   : > { %751 = vmatpush.bf16.msrb.mxu0 %v1132_v28  ;;  %834 = vmatpush.bf16.msrb.mxu1 %v1140_v44 }
  0x2d   : > { %594 = vmatpush.bf16.msra.mxu2 %v1123_v19  ;;  %622 = vmatpush.bf16.msra.mxu3 %v1125_v21 }
  0x2f   : > { %752 = vmatpush.bf16.msrb.mxu0 %v1131_v29  ;;  %835 = vmatpush.bf16.msrb.mxu1 %v1139_v47 }
  0x30   : > { %996 = vmatmul.msk.bf16.vlgmr.msrb.gmra.mxu2 %vm415_vm0, %v365_v22  ;;  %1005 = vmatmul.msk.bf16.vlgmr.msrb.gmra.mxu3 %vm415_vm0, %v366_v23 }
  0x33   : > { %753 = vmatpush.bf16.msrb.mxu0 %v1130_v30  ;;  %836 = vmatpush.bf16.msrb.mxu1 %v1138_v50 }
  0x37   : > { %754 = vmatpush.bf16.msrb.mxu0 %v1129_v31  ;;  %837 = vmatpush.bf16.msrb.mxu1 %v1137_v57 }
  0x3b   : > { %755 = vmatpush.bf16.msrb.mxu0 %v1128_v35  ;;  %838 = vmatpush.bf16.msrb.mxu1 %v1136_v9 }
  0x3f   : > { %756 = vmatpush.bf16.msrb.mxu0 %v1127_v37  ;;  %839 = vmatpush.bf16.msrb.mxu1 %v1135_v10 }
  0x40   : > { %1032 = vmatmul.msk.bf16.vlgmr.msra.gmra.mxu2 %vm415_vm0, %v369_v24  ;;  %1041 = vmatmul.msk.bf16.vlgmr.msra.gmra.mxu3 %vm415_vm0, %v370_v25 }
  0x90   : > { %v677_v2 = vpop.permute.xlu0 %676 }
  0x9f   : > { %v540_v32 = vpop.f32.mrf.mxu0  ;;  %v568_v36 = vpop.f32.mrf.mxu1 }
  0xa0   : > { %v654_v56 = vrot.slane %v540_v32, 4  ;;  %v657_v59 = vrot.slane %v568_v36, 3 }
  0xa3   : > { %v428_v33 = vpop.f32.mrf.mxu2  ;;  %v456_v34 = vpop.f32.mrf.mxu3 }
  0xa4   : > { %v645_v48 = vrot.slane %v456_v34, 7 }
  0xa6   : > { %v647_v51 = vsel %vm646_vm1, %v645_v48, %v428_v33 }
  0xa7   : > { %v542_v38 = vpop.f32.mrf.mxu0  ;;  %v570_v41 = vpop.f32.mrf.mxu1 }
  0xab   : > { %v430_v39 = vpop.f32.mrf.mxu2  ;;  %v458_v40 = vpop.f32.mrf.mxu3 }
  0xb3   : > { %v484_v45 = vpop.f32.mrf.mxu2  ;;  %v512_v46 = vpop.f32.mrf.mxu3 }
  0xb4   : > { %v648_v49 = vrot.slane %v484_v45, 6  ;;  %v651_v52 = vrot.slane %v512_v46, 5 }
  0xb6   : > { %v650_v55 = vsel %vm649_vm2, %v648_v49, %v647_v51 }
  0xb7   : > { %v653_v58 = vsel %vm652_vm3, %v651_v52, %v650_v55 }
  0xb8   : > { %v656_v60 = vsel %vm655_vm4, %v654_v56, %v653_v58 }
  0xb9   : > { %v659_v1 = vsel %vm658_vm5, %v657_v59, %v656_v60 }
  0xbb   : > { %v486_v53 = vpop.f32.mrf.mxu2  ;;  %v514_v54 = vpop.f32.mrf.mxu3 }
  0xc3   : > { %v596_v61 = vpop.f32.mrf.mxu2  ;;  %v624_v62 = vpop.f32.mrf.mxu3 }
  0xc4   : > { %v660_v63 = vrot.slane %v596_v61, 2  ;;  %v663_v0 = vrot.slane %v624_v62, 1 }
  0xc6   : > { %v662_v3 = vsel %vm661_vm6, %v660_v63, %v659_v1 }
  0xc7   : > { %v665_v4 = vsel %vm664_vm7, %v663_v0, %v662_v3 }
  0xc8   : > { %v679_v5 = vmul.f32 %v677_v2, %v665_v4 }
  0xca   : > { %v680_v6 = vpack.c.bf16 %v679_v5, %v679_v5 }
  0xcb   : > { %v598_v7 = vpop.f32.mrf.mxu2  ;;  %v626_v8 = vpop.f32.mrf.mxu3 }
  0xcc   : > { %757 = vmatmul.bf16.vlgmr.msrb.gmra.mxu0 %v680_v6 }
 0x149   : > { %v758_v12 = vpop.f32.mrf.mxu0 }
 0x14a   : > { %v759_v13 = vadd.f32 %v1200_v11, %v758_v12 }
 0x14c   : > { %v762_v14 = vmax.f32 %v759_v13, 0.0 }
 0x14e   : > { %v763_v15 = vpack.c.bf16 %v762_v14, %v762_v14 }
 0x150   : > { %840 = vmatmul.bf16.vlgmr.msrb.gmra.mxu1 %v763_v15 }
 0x151   : > { %v760_v16 = vpop.f32.mrf.mxu0 }
 0x1cd   : > { %v841_v18 = vpop.f32.mrf.mxu1 }
 0x1ce   : > { %v842_v19 = vadd.f32 %v1201_v17, %v841_v18 }
 0x1d0   : > { %845 = vst [vmem:[%s332_s17] sm:$0xff] %v842_v19 }
 0x1d1   : > { %1229 = shalt.err (!%p1226_p6)
}
 0x1d2   : > { %1143 = dma.vmem_to_hbm [thread:$0]  (%p1363_p4), %s860_s18, 128, %s862_s19, %s847_s20  }
 0x1d5   : > { %v843_v20 = vpop.f32.mrf.mxu1 }
 0x1d6 PF: > { %p1149_p7 = scmp.ge.s32.totalorder %s1280_s29, 2  ;;  %s873_s23 = sand.u32 1, %s1260_s24  }
 0x1d7   : > { %s874_s27 = scalar_lea.sflag [#allocation4], %s873_s23 }
 0x1d8   : > { %p1146_p9 = pnand %p1149_p7, %p1370_p8 }
 0x1da   : > { %p1147_p10 = pneg %p1146_p9 }
 0x1dc   : > { %1255 = dma.done.wait (%p1147_p10), %s874_s27, 128  }
 0x1dd   : > { %1257 = vsyncadd (%p1147_p10), %s874_s27, 4294967168  ;;  %s20_s29 = sadd.s32 1, %s1280_s29   ;;  %s1531_s24 = smov %s1264_s25 }
 0x1de   : > { %p17_p11 = scmp.ge.s32.totalorder %s20_s29, 4   ;;  %s1532_s25 = smov %s1268_s26 }
 0x1df   : > { %s1533_s26 = smov %s1376_s14  ;;  %s1534_s27 = smov %s1276_s28 }
 0x1e0   : > { %s1535_s28 = smov %s1537_s9  ;;  %19 = sbr.rel (!%p17_p11) target bundleno = 4 (0x4), region = 97 }
 0x1e5   :  { %880 = vsyncpa [#allocation4], 1 }
 0x1e6   :  { %882 = vsyncpa [#allocation4 + $0x1], 1 }

</bundles_post_ra>
